<compile_context>
chip_gen: v7x
topology: tpu7x:2x2x1
jax: 0.10.0
libtpu: 0.0.40
codegen_flags: <defaults>
</compile_context>

<pallas_src>
import math

import jax
import jax.numpy as jnp
import numpy as np
from jax.experimental import pallas as pl
from jax.experimental.pallas import tpu as pltpu


def _round_up(x, m):
    return (x + m - 1) // m * m


def _im2col_matmul_kernel(p_ref, w_ref, o_ref):
    # p_ref: (1, TM, KKp) f32   w_ref: (1, KKp, COp) f32   o_ref: (1, TM, COp)
    o_ref[0] = jnp.dot(p_ref[0], w_ref[0],
                       preferred_element_type=jnp.float32).astype(o_ref.dtype)


def modulated_conv2d(x_nchw, style, weight, mod_weight, mod_bias, *,
                     demodulate=True, eps=1e-8, lr_mul=1.0):
    """ModulatedConv2d forward (standard path).

    x_nchw:     (B, C_in, H, W)
    style:      (B, style_dim)
    weight:     (1, C_out, C_in, K, K)   -- self.weight
    mod_weight: (C_in, style_dim)        -- EqualLinear (modulation) weight
    mod_bias:   (C_in,)                  -- EqualLinear (modulation) bias
    """
    b, c_in, h, w = x_nchw.shape
    _, c_out, c_in_w, k, k2 = weight.shape
    assert c_in == c_in_w and k == k2
    style_dim = style.shape[-1]
    pad = k // 2

    # ---- glue (tiny, plain JAX): style modulation + demodulation ---------------
    mod_scale = (1.0 / math.sqrt(style_dim)) * lr_mul
    s = style @ (mod_weight * mod_scale).T + mod_bias * lr_mul          # (B, C_in)

    conv_scale = 1.0 / math.sqrt(c_in * k * k)
    w_mod = conv_scale * weight * s[:, None, :, None, None]             # (B, Co, Ci, K, K)
    if demodulate:
        demod = jax.lax.rsqrt(jnp.sum(w_mod * w_mod, axis=(2, 3, 4)) + eps)
        w_mod = w_mod * demod[:, :, None, None, None]

    # ---- glue: im2col + lane-dense padding -------------------------------------
    x_nhwc = jnp.transpose(x_nchw, (0, 2, 3, 1))
    x_p = jnp.pad(x_nhwc, ((0, 0), (pad, pad), (pad, pad), (0, 0)))

    h_out, w_out = h, w                       # stride 1, "same" padding
    m = h_out * w_out
    kk = k * k * c_in

    cols = []
    for kh in range(k):
        for kw in range(k):
            cols.append(x_p[:, kh:kh + h_out, kw:kw + w_out, :])
    patches = jnp.concatenate(cols, axis=-1).reshape(b, m, kk)          # (B, M, k*k*Ci)

    # flattened weight, contraction index ordered (kh, kw, c_in) to match patches
    w_flat = jnp.transpose(w_mod, (0, 3, 4, 2, 1)).reshape(b, kk, c_out)

    kk_p = _round_up(kk, 128)                 # lane-dense contraction
    co_p = _round_up(c_out, 128)              # lane-dense output channels
    tm = min(_round_up(m, 8), 512)            # M-tile (rows per grid step)
    m_p = _round_up(m, tm)

    patches = jnp.pad(patches, ((0, 0), (0, m_p - m), (0, kk_p - kk))).astype(jnp.float32)
    w_flat = jnp.pad(w_flat, ((0, 0), (0, kk_p - kk), (0, co_p - c_out))).astype(jnp.float32)

    # ---- hot path: one deep MXU contraction per (batch, M-tile) ----------------
    n_mt = m_p // tm
    blk_bytes = 4 * (tm * kk_p + kk_p * co_p + tm * co_p)
    vmem_budget = int(min(max(2 * blk_bytes + (4 << 20), 16 << 20), 48 << 20))

    out_padded = pl.pallas_call(
        _im2col_matmul_kernel,
        out_shape=jax.ShapeDtypeStruct((b, m_p, co_p), x_nchw.dtype),
        grid_spec=pltpu.PrefetchScalarGridSpec(
            num_scalar_prefetch=0,
            grid=(b, n_mt),
            in_specs=[
                pl.BlockSpec((1, tm, kk_p), lambda bi, mi: (bi, mi, 0)),
                pl.BlockSpec((1, kk_p, co_p), lambda bi, mi: (bi, 0, 0)),
            ],
            out_specs=pl.BlockSpec((1, tm, co_p), lambda bi, mi: (bi, mi, 0)),
        ),
        compiler_params=pltpu.CompilerParams(
            dimension_semantics=("parallel", "parallel"),
            vmem_limit_bytes=vmem_budget),
    )(patches, w_flat)

    # ---- glue: strip padding, back to NCHW --------------------------------------
    out = out_padded[:, :m, :c_out].reshape(b, h_out, w_out, c_out)
    return jnp.transpose(out, (0, 3, 1, 2))


if __name__ == "__main__":
    # Small shapes consistent with the module's forward.
    B, C_IN, C_OUT, H, W = 2, 4, 8, 16, 16
    K, STYLE_DIM = 3, 32
    DEMODULATE = True

    key = jax.random.PRNGKey(0)
    k_x, k_s, k_w, k_m = jax.random.split(key, 4)

    x = jax.random.normal(k_x, (B, C_IN, H, W), dtype=jnp.float32)
    style = jax.random.normal(k_s, (B, STYLE_DIM), dtype=jnp.float32)

    # Parameters matching the torch module's init: weight ~ randn, modulation
    # weight ~ randn/lr_mul (lr_mul=1), modulation bias filled with bias_init=1.
    weight = jax.random.normal(k_w, (1, C_OUT, C_IN, K, K), dtype=jnp.float32)
    mod_weight = jax.random.normal(k_m, (C_IN, STYLE_DIM), dtype=jnp.float32)
    mod_bias = jnp.ones((C_IN,), dtype=jnp.float32)

    out = modulated_conv2d(x, style, weight, mod_weight, mod_bias,
                           demodulate=DEMODULATE)
    out = jax.block_until_ready(out)

    # Silent correctness check against a plain-XLA reference of the same math.
    mod_scale = 1.0 / math.sqrt(STYLE_DIM)
    s = style @ (mod_weight * mod_scale).T + mod_bias
    conv_scale = 1.0 / math.sqrt(C_IN * K * K)
    w_mod = conv_scale * weight * s[:, None, :, None, None]
    demod = jax.lax.rsqrt(jnp.sum(w_mod * w_mod, axis=(2, 3, 4)) + 1e-8)
    w_mod = w_mod * demod[:, :, None, None, None]

    def one_sample(xi, wi):
        return jax.lax.conv_general_dilated(
            xi[None], wi, window_strides=(1, 1),
            padding=((K // 2, K // 2), (K // 2, K // 2)),
            dimension_numbers=("NCHW", "OIHW", "NCHW"))[0]

    ref = jax.vmap(one_sample)(x, w_mod)
    np.testing.assert_allclose(np.asarray(out), np.asarray(ref), rtol=1e-4, atol=1e-4)

    print("KERNEL_OK")
</pallas_src>

<mosaic_0001>
module attributes {stable_mosaic.version = 11 : i64} {
  func.func @_im2col_matmul_kernel(%arg0: i32, %arg1: i32, %arg2: memref<1x256x128xf32, #tpu.memory_space<vmem>>, %arg3: memref<1x128x128xf32, #tpu.memory_space<vmem>>, %arg4: memref<1x256x128xf32, #tpu.memory_space<vmem>>) attributes {dimension_semantics = [#tpu.dimension_semantics<parallel>, #tpu.dimension_semantics<parallel>], iteration_bounds = array<i64: 2, 1>, scalar_prefetch = 0 : i64, scratch_operands = 0 : i64, tpu.core_type = #tpu.core_type<tc>, window_params = [{transform_indices = @transform_0, window_bounds = array<i64: 1, 256, 128>}, {transform_indices = @transform_1, window_bounds = array<i64: 1, 128, 128>}, {transform_indices = @transform_2, window_bounds = array<i64: 1, 256, 128>}]} {
    %c0 = arith.constant 0 : index
    %c0_0 = arith.constant 0 : index
    %c0_1 = arith.constant 0 : index
    %0 = vector.load %arg2[%c0, %c0_0, %c0_1] : memref<1x256x128xf32, #tpu.memory_space<vmem>>, vector<1x256x128xf32>
    %1 = vector.shape_cast %0 : vector<1x256x128xf32> to vector<256x128xf32>
    %c0_2 = arith.constant 0 : index
    %c0_3 = arith.constant 0 : index
    %c0_4 = arith.constant 0 : index
    %2 = vector.load %arg3[%c0_2, %c0_3, %c0_4] : memref<1x128x128xf32, #tpu.memory_space<vmem>>, vector<1x128x128xf32>
    %3 = vector.shape_cast %2 : vector<1x128x128xf32> to vector<128x128xf32>
    %cst = arith.constant dense<0.000000e+00> : vector<256x128xf32>
    %4 = tpu.matmul %1, %3, %cst {dimension_numbers = #tpu.dot_dimension_numbers<[1], [0], [0], [1], [0, 0, 1, 1], [], []>} : vector<256x128xf32>, vector<128x128xf32>, vector<256x128xf32> -> vector<256x128xf32>
    %c0_5 = arith.constant 0 : index
    %c0_6 = arith.constant 0 : index
    %c0_7 = arith.constant 0 : index
    %5 = vector.load %arg4[%c0_5, %c0_6, %c0_7] : memref<1x256x128xf32, #tpu.memory_space<vmem>>, vector<1x256x128xf32>
    %6 = vector.shape_cast %5 : vector<1x256x128xf32> to vector<256x128xf32>
    %7 = vector.shape_cast %4 : vector<256x128xf32> to vector<1x256x128xf32>
    tpu.vector_store %arg4[%c0_5, %c0_6, %c0_7], %7 {strides = array<i32>} : memref<1x256x128xf32, #tpu.memory_space<vmem>>, vector<1x256x128xf32>,
    return
  }
  func.func @transform_0(%arg0: i32, %arg1: i32) -> (i32, i32, i32) {
    %c0_i32 = arith.constant 0 : i32
    %c0_i32_0 = arith.constant 0 : i32
    return %arg0, %arg1, %c0_i32 : i32, i32, i32
  }
  func.func @transform_1(%arg0: i32, %arg1: i32) -> (i32, i32, i32) {
    %c0_i32 = arith.constant 0 : i32
    %c0_i32_0 = arith.constant 0 : i32
    %c0_i32_1 = arith.constant 0 : i32
    return %arg0, %c0_i32, %c0_i32_0 : i32, i32, i32
  }
  func.func @transform_2(%arg0: i32, %arg1: i32) -> (i32, i32, i32) {
    %c0_i32 = arith.constant 0 : i32
    %c0_i32_0 = arith.constant 0 : i32
    return %arg0, %arg1, %c0_i32 : i32, i32, i32
  }
}

</mosaic_0001>

<bundles_post_ra>
// kernel: tpu_custom_call.1
= control target key start
LH: loop header
LB: loop body
LE: loop exit
PB: predicated region body
PF: predicated region fallthrough
CT: control target
= control target key end

     0   :  { %7 = vsyncpa [#allocation3], 0  ;;  %s1414_s0 = inlined_call_operand.hbm [shape: f32[2,256,128], index: 0, kind: input, shape index: {}]   ;;  %s1415_s1 = inlined_call_operand.hbm [shape: f32[2,128,128], index: 1, kind: input, shape index: {}]   ;;  %s1416_s2 = inlined_call_operand.hbm [shape: f32[2,256,128], index: 2, kind: output, shape index: {}]  }
   0x1   :  { %9 = vsyncpa [#allocation3 + $0x1], 0 }
   0x2   :  { %10 = vsyncpa [#allocation6], 0 }
   0x3   :  { %12 = vsyncpa [#allocation6 + $0x1], 0 }
   0x4   :  { %13 = vsyncpa [#allocation4], 0 }
   0x5   :  { %15 = vsyncpa [#allocation4 + $0x1], 0  ;;  %s1092_s9 = smov 0   ;;  %s1094_s10 = smov 0  }
   0x6   :  { %s1096_s11 = smov 0   ;;  %s1098_s12 = smov 0  }
   0x7   :  { %s1100_s13 = smov 0   ;;  %s1102_s14 = smov 0  }
   0x8 LB: > { %s653_s15 = sadd.s32 4294967295, %s1068_s14   ;;  %s654_s16 = sadd.s32 4294967294, %s1068_s14   ;;  %s1068_s14 = sphi %s1102_s14, %s21_s14   ;;  %s1064_s13 = sphi %s1100_s13, %s1434_s13   ;;  %s1060_s12 = sphi %s1098_s12, %s1433_s12   ;;  %s1056_s11 = sphi %s1096_s11, %s1432_s11   ;;  %s1052_s10 = sphi %s1094_s10, %s1431_s10   ;;  %s1048_s9 = sphi %s1092_s9, %s1430_s9  }
   0x9   : > { %s33_s17 = sadd.s32 1, %s1064_s13  ;;  %s42_s18 = sadd.s32 1, %s1056_s11 }
   0xa   : > { %p35_p0 = scmp.ge.s32.totalorder %s33_s17, 2  ;;  %p49_p1 = scmp.ne.s32.totalorder %s1056_s11, %s1052_s10 }
   0xb   : > { %p50_p2 = scmp.eq.s32.totalorder %s1068_s14, 0  ;;  %p55_p3 = scmp.ne.s32.totalorder %s1052_s10, %s1048_s9 }
   0xc   : > { %s1436_s17 = smov (%p35_p0, %s33_s17), 0  ;;  %p56_p5 = scmp.eq.s32.totalorder %s653_s15, 0 }
   0xd   : > { %p1133_p4 = por %p50_p2, %p49_p1  ;;  %s37_s20 = ssub.s32 %s1064_s13, %s1436_s17 }
   0xe   : > { %p107_p6 = scmp.eq.s32.totalorder %s653_s15, 1  ;;  %p40_p7 = scmp.eq.s32.totalorder %s37_s20, 0 }
   0xf   : > { %p1139_p8 = por %p56_p5, %p55_p3  ;;  %p113_p10 = scmp.eq.s32.totalorder %s654_s16, 1 }
  0x10   : > { %p1143_p9 = por %p107_p6, %p49_p1  ;;  %p868_p13 = scmp.lt.s32.totalorder %s1068_s14, 2 }
  0x11   : > { %s1420_s21 = scalar_select %p1139_p8, 1, 0 }
  0x12   : > { %s1421_s22 = scalar_select %p1143_p9, 1, 0 }
  0x13   : > { %s1148_s23 = scalar_select %p40_p7, %s1056_s11, %s42_s18  }
  0x14   : > { %p1150_p11 = por %p113_p10, %p55_p3  ;;  %s1157_s25 = sand.u32 1, %s1056_s11  }
  0x15   : > { %s657_s26 = sshll.u32 %s1157_s25, 8  ;;  %s672_s27 = sshll.u32 %s1064_s13, 12 }
  0x16   : > { %s1422_s24 = scalar_select %p1150_p11, 1, 0 }
  0x17   : > { %s1164_s30 = scalar_lea.hbm %s1414_s0, %s672_s27  ;;  %s137_s3 = scalar_lea.vmem [#allocation2], %s657_s26 }
  0x18   : > { %s146_s4 = sshll.u32 %s137_s3, 4  ;;  %p1170_p0 = pnand %p868_p13, %p1133_p4  ;;  %s1166_s4 = int_to_ptr.vmem [resolvable:$true] %s146_s4 }
  0x19   : > { %s134_s6 = scalar_lea.sflag [#allocation3], %s1157_s25  ;;  %s922_s7 = scalar_lea.hbm %s1164_s30, 4096 }
  0x1a   : > { %p923_p2 = scmp.ne.s32.totalorder %s1164_s30, %s922_s7  ;;  %p924_p3 = pneg %p1170_p0 }
  0x1b   : > { %s927_s16 = scalar_lea.hbm %s1414_s0, 8192  ;;  %p928_p4 = scmp.lt.u32.totalorder %s1164_s30, %s1414_s0 }
  0x1c   : > { %p925_p5 = pnand %p924_p3, %p923_p2  ;;  %p929_p7 = scmp.lt.u32.totalorder %s927_s16, %s922_s7 }
  0x1d   : > { %p931_p13 = scmp.lt.u32.totalorder %s922_s7, %s1164_s30 }
  0x1e   : > { %p926_p6 = pneg %p925_p5  ;;  %p930_p10 = por %p929_p7, %p928_p4 }
  0x20   : > { %p932_p12 = por %p931_p13, %p930_p10 }
  0x22   : > { %p933_p1 = pnand %p932_p12, %p926_p6 }
  0x24   : > { %936 = shalt.err (!%p933_p1)
}
  0x25   : > { %s937_s20 = scalar_lea.vmem %s1166_s4, 4096  ;;  %s1070_s26 = smov [#allocation2]  }
  0x26   : > { %p938_p2 = scmp.ne.s32.totalorder %s1166_s4, %s937_s20  ;;  %s942_s27 = sshll.u32 %s1070_s26, 4  ;;  %s943_s27 = int_to_ptr.vmem [resolvable:$false] %s942_s27 }
  0x27   : > { %s944_s28 = scalar_lea.vmem %s943_s27, 8192  ;;  %p945_p9 = scmp.lt.s32.totalorder %s1166_s4, %s943_s27 }
  0x28   : > { %p940_p5 = pnand %p938_p2, %p924_p3  ;;  %p946_p4 = scmp.lt.s32.totalorder %s944_s28, %s937_s20 }
  0x2a   : > { %p941_p11 = pneg %p940_p5  ;;  %p947_p7 = por %p946_p4, %p945_p9 }
  0x2c   : > { %p948_p10 = pnand %p947_p7, %p941_p11 }
  0x2e   : > { %951 = shalt.err (!%p948_p10)
}
  0x2f   : > { %s1071_s29 = smov 128   ;;  %s1072_s3 = smov 8  }
  0x30   : > { %860 = dma.hbm_to_vmem [thread:$0]  (!%p1170_p0), %s1164_s30, 4096, %s1166_s4, %s134_s6, %s1071_s29, %s1071_s29, %s1072_s3  }
  0x31   : > { %p175_p9 = scmp.lt.s32.totalorder %s1068_s14, 3  ;;  %s660_s7 = sshll.u32 %s1157_s25, 7 }
  0x32   : > { %s673_s8 = sshll.u32 %s1064_s13, 11  ;;  %p1424_p11 = scmp.ge.s32.totalorder %s1068_s14, 1 }
  0x33   : > { %s1218_s19 = scalar_lea.hbm %s1415_s1, %s673_s8  ;;  %s160_s20 = scalar_lea.vmem [#allocation5], %s660_s7 }
  0x34   : > { %p1211_p12 = pnand %p1424_p11, %p175_p9  ;;  %s167_s26 = sshll.u32 %s160_s20, 4  ;;  %s1220_s26 = int_to_ptr.vmem [resolvable:$true] %s167_s26 }
  0x35   : > { %s157_s30 = scalar_lea.sflag [#allocation6], %s1157_s25  ;;  %s952_s4 = scalar_lea.hbm %s1218_s19, 2048 }
  0x36   : > { %p953_p1 = scmp.ne.s32.totalorder %s1218_s19, %s952_s4  ;;  %s957_s28 = scalar_lea.hbm %s1415_s1, 4096 }
  0x37   : > { %p958_p2 = scmp.lt.u32.totalorder %s1218_s19, %s1415_s1  ;;  %p959_p5 = scmp.lt.u32.totalorder %s957_s28, %s952_s4 }
  0x38   : > { %p955_p6 = pnand %p953_p1, %p924_p3  ;;  %p961_p7 = scmp.lt.u32.totalorder %s952_s4, %s1218_s19 }
  0x39   : > { %p960_p4 = por %p959_p5, %p958_p2 }
  0x3a   : > { %p956_p13 = pneg %p955_p6 }
  0x3b   : > { %p962_p10 = por %p961_p7, %p960_p4 }
  0x3d   : > { %p963_p9 = pnand %p962_p10, %p956_p13 }
  0x3f   : > { %966 = shalt.err (!%p963_p9)
}
  0x40   : > { %s967_s7 = scalar_lea.vmem %s1220_s26, 2048  ;;  %s1073_s18 = smov [#allocation5]  }
  0x41   : > { %p968_p11 = scmp.ne.s32.totalorder %s1220_s26, %s967_s7  ;;  %s972_s20 = sshll.u32 %s1073_s18, 4  ;;  %s973_s20 = int_to_ptr.vmem [resolvable:$false] %s972_s20 }
  0x42   : > { %s974_s6 = scalar_lea.vmem %s973_s20, 4096  ;;  %p975_p8 = scmp.lt.s32.totalorder %s1220_s26, %s973_s20 }
  0x43   : > { %p970_p1 = pnand %p968_p11, %p924_p3  ;;  %p976_p2 = scmp.lt.s32.totalorder %s974_s6, %s967_s7 }
  0x45   : > { %p971_p6 = pneg %p970_p1  ;;  %p977_p5 = por %p976_p2, %p975_p8 }
  0x47   : > { %p978_p4 = pnand %p977_p5, %p971_p6 }
  0x49   : > { %981 = shalt.err (!%p978_p4)
}
  0x4a   : > { %863 = dma.hbm_to_vmem [thread:$0]  (!%p1170_p0), %s1218_s19, 2048, %s1220_s26, %s157_s30, %s1071_s29, %s1071_s29, %s1072_s3  }
  0x4b   : > { %179 = sbr.rel (%p1211_p12) target bundleno = 377 (0x179), region = 28  ;;  %s1254_s4 = sand.u32 (!%p1211_p12), 1, %s1052_s10  }
  0x4c   : > { %s664_s27 = sshll.u32 (!%p1211_p12), %s1254_s4, 8  ;;  %s182_s5 = scalar_lea.sflag (!%p1211_p12), [#allocation3], %s1254_s4 }
  0x4d   : > { %s1260_s28 = scalar_lea.vmem (!%p1211_p12), [#allocation2], %s664_s27  ;;  %p1426_p8 = scmp.ne.s32.totalorder (!%p1211_p12), %s1420_s21, 0 }
  0x52   : > { %1035 = dma.done.wait (%p1426_p8), %s182_s5, 4096  }
  0x53   : > { %1037 = vsyncadd (%p1426_p8), %s182_s5, 4294963200  ;;  %s665_s25 = sshll.u32 %s1254_s4, 7  ;;  %s191_s29 = scalar_lea.sflag [#allocation6], %s1254_s4 }
  0x54   : > { %s1268_s3 = scalar_lea.vmem [#allocation5], %s665_s25 }
  0x55   : > { %1039 = dma.done.wait (%p1426_p8), %s191_s29, 2048  }
  0x56   : > { %1041 = vsyncadd (%p1426_p8), %s191_s29, 4294965248  ;;  %v254_v0 = vld [vmem:[%s1268_s3] sm:$0xff]  ;;  %v255_v1 = vld [vmem:[%s1268_s3 + $0x8] sm:$0xff]  ;;  %s1324_s21 = scalar_lea.vmem [#allocation7], %s664_s27  ;;  %s674_s15 = sshll.u32 %s1060_s12, 12 }
  0x57   : > { %v256_v2 = vld [vmem:[%s1268_s3 + $0x10] sm:$0xff]  ;;  %v803_v3 = vpack.c.bf16 %v255_v1, %v254_v0  ;;  %v257_v4 = vld [vmem:[%s1268_s3 + $0x18] sm:$0xff]  ;;  %v258_v6 = vld [vmem:[%s1268_s3 + $0x20] sm:$0xff]  ;;  %s543_s19 = sshll.u32 %s1324_s21, 4  ;;  %s1359_s8 = scalar_lea.hbm %s1416_s2, %s674_s15  ;;  %s1361_s19 = int_to_ptr.vmem [resolvable:$true] %s543_s19 }
  0x58   : > { %v807_v5 = vpack.c.bf16 %v257_v4, %v256_v2  ;;  %v259_v7 = vld [vmem:[%s1268_s3 + $0x28] sm:$0xff]  ;;  %v222_v9 = vld [vmem:[%s1260_s28] sm:$0xff]  ;;  %v260_v11 = vld [vmem:[%s1268_s3 + $0x30] sm:$0xff]  ;;  %s528_s12 = scalar_lea.sflag [#allocation4], %s1254_s4  ;;  %s982_s16 = scalar_lea.vmem %s1361_s19, 4096 }
  0x59   : > { %804 = vmatprep.subr.bf16.mxu0 %v803_v3  ;;  %835 = vmatprep.subr.bf16.mxu1 %v803_v3  ;;  %v811_v8 = vpack.c.bf16 %v259_v7, %v258_v6  ;;  %v238_v10 = vld [vmem:[%s1260_s28 + $0x80] sm:$0xff]  ;;  %v261_v12 = vld [vmem:[%s1268_s3 + $0x38] sm:$0xff]  ;;  %v263_v15 = vld [vmem:[%s1268_s3 + $0x48] sm:$0xff]  ;;  %p983_p0 = scmp.ne.s32.totalorder %s1361_s19, %s982_s16  ;;  %p1427_p3 = scmp.ne.s32.totalorder %s1421_s22, 0 }
  0x5a   : > { %806 = vmatpush3.bf16.msra.mxu0 %v803_v3  ;;  %843 = vmatpush3.bf16.msra.mxu1 %v803_v3  ;;  %v815_v13 = vpack.c.bf16 %v261_v12, %v260_v11  ;;  %v262_v14 = vld [vmem:[%s1268_s3 + $0x40] sm:$0xff]  ;;  %v264_v17 = vld [vmem:[%s1268_s3 + $0x50] sm:$0xff]  ;;  %v265_v18 = vld [vmem:[%s1268_s3 + $0x58] sm:$0xff]  ;;  %s1074_s7 = smov [#allocation7]  }
  0x5b   : > { %808 = vmatprep.subr.bf16.mxu0 %v807_v5  ;;  %836 = vmatprep.subr.bf16.mxu1 %v807_v5  ;;  %v819_v16 = vpack.c.bf16 %v263_v15, %v262_v14  ;;  %v823_v19 = vpack.c.bf16 %v265_v18, %v264_v17  ;;  %v266_v20 = vld [vmem:[%s1268_s3 + $0x60] sm:$0xff]  ;;  %v267_v21 = vld [vmem:[%s1268_s3 + $0x68] sm:$0xff]  ;;  %v268_v23 = vld [vmem:[%s1268_s3 + $0x70] sm:$0xff]  ;;  %p984_p12 = pnand %p983_p0, %p1427_p3  ;;  %s986_s18 = sshll.u32 %s1074_s7, 4  ;;  %s987_s18 = int_to_ptr.vmem [resolvable:$false] %s986_s18 }
  0x5c   : > { %755 = vmatprep.mubr.f32.mxu0 %v222_v9  ;;  %779 = vmatprep.mubr.f32.mxu1 %v238_v10  ;;  %v827_v22 = vpack.c.bf16 %v267_v21, %v266_v20  ;;  %v269_v24 = vld [vmem:[%s1268_s3 + $0x78] sm:$0xff]  ;;  %v223_v26 = vld [vmem:[%s1260_s28 + $0x8] sm:$0xff]  ;;  %v224_v28 = vld [vmem:[%s1260_s28 + $0x10] sm:$0xff]  ;;  %s988_s20 = scalar_lea.vmem %s987_s18, 8192  ;;  %p989_p7 = scmp.lt.s32.totalorder %s1361_s19, %s987_s18 }
  0x5d   : > { %v831_v25 = vpack.c.bf16 %v269_v24, %v268_v23  ;;  %v239_v27 = vld [vmem:[%s1260_s28 + $0x88] sm:$0xff]  ;;  %v240_v29 = vld [vmem:[%s1260_s28 + $0x90] sm:$0xff]  ;;  %v225_v30 = vld [vmem:[%s1260_s28 + $0x18] sm:$0xff]  ;;  %p985_p13 = pneg %p984_p12  ;;  %p990_p10 = scmp.lt.s32.totalorder %s988_s20, %s982_s16 }
  0x5e   : > { %810 = vmatpush3.bf16.msra.mxu0 %v807_v5  ;;  %844 = vmatpush3.bf16.msra.mxu1 %v807_v5  ;;  %v241_v31 = vld [vmem:[%s1260_s28 + $0x98] sm:$0xff]  ;;  %v226_v32 = vld [vmem:[%s1260_s28 + $0x20] sm:$0xff]  ;;  %v227_v34 = vld [vmem:[%s1260_s28 + $0x28] sm:$0xff] }
  0x5f   : > { %812 = vmatprep.subr.bf16.mxu0 %v811_v8  ;;  %837 = vmatprep.subr.bf16.mxu1 %v811_v8  ;;  %v242_v33 = vld [vmem:[%s1260_s28 + $0xa0] sm:$0xff]  ;;  %v243_v35 = vld [vmem:[%s1260_s28 + $0xa8] sm:$0xff]  ;;  %v228_v36 = vld [vmem:[%s1260_s28 + $0x30] sm:$0xff]  ;;  %p991_p9 = por %p990_p10, %p989_p7 }
  0x60   : > { %v244_v37 = vld [vmem:[%s1260_s28 + $0xb0] sm:$0xff]  ;;  %v229_v38 = vld [vmem:[%s1260_s28 + $0x38] sm:$0xff]  ;;  %v230_v40 = vld [vmem:[%s1260_s28 + $0x40] sm:$0xff] }
  0x61   : > { %v245_v39 = vld [vmem:[%s1260_s28 + $0xb8] sm:$0xff]  ;;  %v246_v41 = vld [vmem:[%s1260_s28 + $0xc0] sm:$0xff]  ;;  %v231_v42 = vld [vmem:[%s1260_s28 + $0x48] sm:$0xff]  ;;  %p992_p11 = pnand %p991_p9, %p985_p13 }
  0x62   : > { %814 = vmatpush3.bf16.msra.mxu0 %v811_v8  ;;  %845 = vmatpush3.bf16.msra.mxu1 %v811_v8  ;;  %v247_v43 = vld [vmem:[%s1260_s28 + $0xc8] sm:$0xff]  ;;  %v232_v44 = vld [vmem:[%s1260_s28 + $0x50] sm:$0xff]  ;;  %v233_v46 = vld [vmem:[%s1260_s28 + $0x58] sm:$0xff] }
  0x63   : > { %816 = vmatprep.subr.bf16.mxu0 %v815_v13  ;;  %838 = vmatprep.subr.bf16.mxu1 %v815_v13  ;;  %v248_v45 = vld [vmem:[%s1260_s28 + $0xd0] sm:$0xff]  ;;  %v249_v47 = vld [vmem:[%s1260_s28 + $0xd8] sm:$0xff]  ;;  %v234_v48 = vld [vmem:[%s1260_s28 + $0x60] sm:$0xff] }
  0x64   : > { %v250_v49 = vld [vmem:[%s1260_s28 + $0xe0] sm:$0xff]  ;;  %v235_v50 = vld [vmem:[%s1260_s28 + $0x68] sm:$0xff]  ;;  %v236_v52 = vld [vmem:[%s1260_s28 + $0x70] sm:$0xff] }
  0x65   : > { %v251_v51 = vld [vmem:[%s1260_s28 + $0xe8] sm:$0xff]  ;;  %v252_v53 = vld [vmem:[%s1260_s28 + $0xf0] sm:$0xff]  ;;  %v237_v54 = vld [vmem:[%s1260_s28 + $0x78] sm:$0xff] }
  0x66   : > { %818 = vmatpush3.bf16.msra.mxu0 %v815_v13  ;;  %846 = vmatpush3.bf16.msra.mxu1 %v815_v13  ;;  %v253_v55 = vld [vmem:[%s1260_s28 + $0xf8] sm:$0xff] }
  0x67   : > { %820 = vmatprep.subr.bf16.mxu0 %v819_v16  ;;  %839 = vmatprep.subr.bf16.mxu1 %v819_v16 }
  0x6a   : > { %822 = vmatpush3.bf16.msra.mxu0 %v819_v16  ;;  %847 = vmatpush3.bf16.msra.mxu1 %v819_v16 }
  0x6b   : > { %824 = vmatprep.subr.bf16.mxu0 %v823_v19  ;;  %840 = vmatprep.subr.bf16.mxu1 %v823_v19 }
  0x6e   : > { %826 = vmatpush3.bf16.msra.mxu0 %v823_v19  ;;  %848 = vmatpush3.bf16.msra.mxu1 %v823_v19 }
  0x6f   : > { %828 = vmatprep.subr.bf16.mxu0 %v827_v22  ;;  %841 = vmatprep.subr.bf16.mxu1 %v827_v22 }
  0x72   : > { %830 = vmatpush3.bf16.msra.mxu0 %v827_v22  ;;  %849 = vmatpush3.bf16.msra.mxu1 %v827_v22 }
  0x73   : > { %832 = vmatprep.subr.bf16.mxu0 %v831_v25  ;;  %842 = vmatprep.subr.bf16.mxu1 %v831_v25 }
  0x76   : > { %834 = vmatpush3.bf16.msra.mxu0 %v831_v25  ;;  %850 = vmatpush3.bf16.msra.mxu1 %v831_v25 }
  0x79   : > { %756 = vmatmul.mubr.f32.vlgmr.msra.gmra.mrb[0].mxu0 %v223_v26  ;;  %780 = vmatmul.mubr.f32.vlgmr.msra.gmra.mrb[0].mxu1 %v239_v27 }
  0x7a   : > { %758 = vmatprep.mubr.f32.mxu0 %v224_v28  ;;  %782 = vmatprep.mubr.f32.mxu1 %v240_v29 }
  0x7d   : > { %759 = vmatmul.mubr.f32.gmra.mrb[2].mxu0 %v225_v30  ;;  %783 = vmatmul.mubr.f32.gmra.mrb[2].mxu1 %v241_v31 }
  0x7e   : > { %761 = vmatprep.mubr.f32.mxu0 %v226_v32  ;;  %785 = vmatprep.mubr.f32.mxu1 %v242_v33 }
  0x81   : > { %762 = vmatmul.mubr.f32.gmra.mrb[4].mxu0 %v227_v34  ;;  %786 = vmatmul.mubr.f32.gmra.mrb[4].mxu1 %v243_v35 }
  0x82   : > { %764 = vmatprep.mubr.f32.mxu0 %v228_v36  ;;  %788 = vmatprep.mubr.f32.mxu1 %v244_v37 }
  0x85   : > { %765 = vmatmul.mubr.f32.gmra.mrb[6].mxu0 %v229_v38  ;;  %789 = vmatmul.mubr.f32.gmra.mrb[6].mxu1 %v245_v39 }
  0x86   : > { %767 = vmatprep.mubr.f32.mxu0 %v230_v40  ;;  %791 = vmatprep.mubr.f32.mxu1 %v246_v41 }
  0x89   : > { %768 = vmatmul.mubr.f32.gmra.mrb[8].mxu0 %v231_v42  ;;  %792 = vmatmul.mubr.f32.gmra.mrb[8].mxu1 %v247_v43 }
  0x8a   : > { %770 = vmatprep.mubr.f32.mxu0 %v232_v44  ;;  %794 = vmatprep.mubr.f32.mxu1 %v248_v45 }
  0x8d   : > { %771 = vmatmul.mubr.f32.gmra.mrb[10].mxu0 %v233_v46  ;;  %795 = vmatmul.mubr.f32.gmra.mrb[10].mxu1 %v249_v47 }
  0x8e   : > { %773 = vmatprep.mubr.f32.mxu0 %v234_v48  ;;  %797 = vmatprep.mubr.f32.mxu1 %v250_v49 }
  0x91   : > { %774 = vmatmul.mubr.f32.gmra.mrb[12].mxu0 %v235_v50  ;;  %798 = vmatmul.mubr.f32.gmra.mrb[12].mxu1 %v251_v51 }
  0x92   : > { %776 = vmatprep.mubr.f32.mxu0 %v236_v52  ;;  %800 = vmatprep.mubr.f32.mxu1 %v252_v53 }
  0x95   : > { %777 = vmatmul.mubr.f32.gmra.mrb[14].mxu0 %v237_v54  ;;  %801 = vmatmul.mubr.f32.gmra.mrb[14].mxu1 %v253_v55 }
 0x14c   : > { %v757_v56 = vpop.f32.mrb[0].mxu0  ;;  %v781_v57 = vpop.f32.mrb[0].mxu1 }
 0x14d   : > { %496 = vst [vmem:[%s1324_s21 + $0x8] sm:$0xff] %v757_v56  ;;  %512 = vst [vmem:[%s1324_s21 + $0x88] sm:$0xff] %v781_v57  ;;  %v336_v58 = vpop.f32.mrb[1].mxu0  ;;  %v416_v59 = vpop.f32.mrb[1].mxu1 }
 0x14e   : > { %495 = vst [vmem:[%s1324_s21] sm:$0xff] %v336_v58  ;;  %511 = vst [vmem:[%s1324_s21 + $0x80] sm:$0xff] %v416_v59 }
 0x150   : > { %v760_v60 = vpop.f32.mrb[2].mxu0  ;;  %v784_v61 = vpop.f32.mrb[2].mxu1 }
 0x151   : > { %498 = vst [vmem:[%s1324_s21 + $0x18] sm:$0xff] %v760_v60  ;;  %514 = vst [vmem:[%s1324_s21 + $0x98] sm:$0xff] %v784_v61  ;;  %v346_v62 = vpop.f32.mrb[3].mxu0  ;;  %v426_v63 = vpop.f32.mrb[3].mxu1 }
 0x152   : > { %497 = vst [vmem:[%s1324_s21 + $0x10] sm:$0xff] %v346_v62  ;;  %513 = vst [vmem:[%s1324_s21 + $0x90] sm:$0xff] %v426_v63 }
 0x154   : > { %v763_v0 = vpop.f32.mrb[4].mxu0  ;;  %v787_v1 = vpop.f32.mrb[4].mxu1 }
 0x155   : > { %500 = vst [vmem:[%s1324_s21 + $0x28] sm:$0xff] %v763_v0  ;;  %516 = vst [vmem:[%s1324_s21 + $0xa8] sm:$0xff] %v787_v1  ;;  %v356_v2 = vpop.f32.mrb[5].mxu0  ;;  %v436_v3 = vpop.f32.mrb[5].mxu1 }
 0x156   : > { %499 = vst [vmem:[%s1324_s21 + $0x20] sm:$0xff] %v356_v2  ;;  %515 = vst [vmem:[%s1324_s21 + $0xa0] sm:$0xff] %v436_v3 }
 0x158   : > { %v766_v4 = vpop.f32.mrb[6].mxu0  ;;  %v790_v5 = vpop.f32.mrb[6].mxu1 }
 0x159   : > { %502 = vst [vmem:[%s1324_s21 + $0x38] sm:$0xff] %v766_v4  ;;  %518 = vst [vmem:[%s1324_s21 + $0xb8] sm:$0xff] %v790_v5  ;;  %v366_v6 = vpop.f32.mrb[7].mxu0  ;;  %v446_v7 = vpop.f32.mrb[7].mxu1 }
 0x15a   : > { %501 = vst [vmem:[%s1324_s21 + $0x30] sm:$0xff] %v366_v6  ;;  %517 = vst [vmem:[%s1324_s21 + $0xb0] sm:$0xff] %v446_v7 }
 0x15c   : > { %v769_v8 = vpop.f32.mrb[8].mxu0  ;;  %v793_v9 = vpop.f32.mrb[8].mxu1 }
 0x15d   : > { %504 = vst [vmem:[%s1324_s21 + $0x48] sm:$0xff] %v769_v8  ;;  %520 = vst [vmem:[%s1324_s21 + $0xc8] sm:$0xff] %v793_v9  ;;  %v376_v10 = vpop.f32.mrb[9].mxu0  ;;  %v456_v11 = vpop.f32.mrb[9].mxu1 }
 0x15e   : > { %503 = vst [vmem:[%s1324_s21 + $0x40] sm:$0xff] %v376_v10  ;;  %519 = vst [vmem:[%s1324_s21 + $0xc0] sm:$0xff] %v456_v11 }
 0x160   : > { %v772_v12 = vpop.f32.mrb[10].mxu0  ;;  %v796_v13 = vpop.f32.mrb[10].mxu1 }
 0x161   : > { %506 = vst [vmem:[%s1324_s21 + $0x58] sm:$0xff] %v772_v12  ;;  %522 = vst [vmem:[%s1324_s21 + $0xd8] sm:$0xff] %v796_v13  ;;  %v386_v14 = vpop.f32.mrb[11].mxu0  ;;  %v466_v15 = vpop.f32.mrb[11].mxu1 }
 0x162   : > { %505 = vst [vmem:[%s1324_s21 + $0x50] sm:$0xff] %v386_v14  ;;  %521 = vst [vmem:[%s1324_s21 + $0xd0] sm:$0xff] %v466_v15 }
 0x164   : > { %v775_v16 = vpop.f32.mrb[12].mxu0  ;;  %v799_v17 = vpop.f32.mrb[12].mxu1 }
 0x165   : > { %508 = vst [vmem:[%s1324_s21 + $0x68] sm:$0xff] %v775_v16  ;;  %524 = vst [vmem:[%s1324_s21 + $0xe8] sm:$0xff] %v799_v17  ;;  %v396_v18 = vpop.f32.mrb[13].mxu0  ;;  %v476_v19 = vpop.f32.mrb[13].mxu1 }
 0x166   : > { %507 = vst [vmem:[%s1324_s21 + $0x60] sm:$0xff] %v396_v18  ;;  %523 = vst [vmem:[%s1324_s21 + $0xe0] sm:$0xff] %v476_v19 }
 0x168   : > { %v778_v20 = vpop.f32.mrb[14].mxu0  ;;  %v802_v21 = vpop.f32.mrb[14].mxu1 }
 0x169   : > { %510 = vst [vmem:[%s1324_s21 + $0x78] sm:$0xff] %v778_v20  ;;  %526 = vst [vmem:[%s1324_s21 + $0xf8] sm:$0xff] %v802_v21  ;;  %v406_v22 = vpop.f32.mrb[15].mxu0  ;;  %v486_v23 = vpop.f32.mrb[15].mxu1 }
 0x16a   : > { %509 = vst [vmem:[%s1324_s21 + $0x70] sm:$0xff] %v406_v22  ;;  %525 = vst [vmem:[%s1324_s21 + $0xf0] sm:$0xff] %v486_v23 }
 0x16b   : > { %995 = shalt.err (!%p992_p11)
}
 0x16c   : > { %s996_s6 = scalar_lea.hbm %s1359_s8, 4096  ;;  %s1000_s28 = scalar_lea.hbm %s1416_s2, 8192 }
 0x16d   : > { %p997_p1 = scmp.ne.s32.totalorder %s1359_s8, %s996_s6  ;;  %p1001_p5 = scmp.lt.u32.totalorder %s1359_s8, %s1416_s2 }
 0x16e   : > { %p1002_p4 = scmp.lt.u32.totalorder %s1000_s28, %s996_s6  ;;  %p1004_p0 = scmp.lt.u32.totalorder %s996_s6, %s1359_s8 }
 0x16f   : > { %p998_p6 = pnand %p997_p1, %p1427_p3 }
 0x170   : > { %p1003_p8 = por %p1002_p4, %p1001_p5 }
 0x171   : > { %p999_p2 = pneg %p998_p6 }
 0x172   : > { %p1005_p12 = por %p1004_p0, %p1003_p8 }
 0x174   : > { %p1006_p13 = pnand %p1005_p12, %p999_p2 }
 0x176   : > { %1009 = shalt.err (!%p1006_p13)
}
 0x177   : > { %s1075_s3 = smov 128   ;;  %s1076_s21 = smov 8  }
 0x178   : > { %855 = dma.vmem_to_hbm [thread:$0]  (%p1427_p3), %s1361_s19, 4096, %s1359_s8, %s528_s12, %s1075_s3, %s1075_s3, %s1076_s21  }
 0x179 PF: > { %s558_s15 = sand.u32 1, %s1048_s9   ;;  %p1428_p7 = scmp.ne.s32.totalorder %s1422_s24, 0 }
 0x17a   : > { %p1429_p10 = scmp.ge.s32.totalorder %s1068_s14, 2  ;;  %s559_s26 = scalar_lea.sflag [#allocation4], %s558_s15 }
 0x17c   : > { %p865_p9 = pnand %p1429_p10, %p1428_p7 }
 0x17e   : > { %1043 = dma.done.wait (!%p865_p9), %s559_s26, 4096  }
 0x17f   : > { %1045 = vsyncadd (!%p865_p9), %s559_s26, 4294963200  ;;  %s21_s14 = sadd.s32 1, %s1068_s14   ;;  %s1430_s9 = smov %s1052_s10 }
 0x180   : > { %p18_p11 = scmp.ge.s32.totalorder %s21_s14, 4   ;;  %s1431_s10 = smov %s1056_s11 }
 0x181   : > { %s1432_s11 = smov %s1148_s23  ;;  %s1433_s12 = smov %s1064_s13 }
 0x182   : > { %s1434_s13 = smov %s1436_s17  ;;  %20 = sbr.rel (!%p18_p11) target bundleno = 8 (0x8), region = 86 }
 0x189   :  { %564 = vsyncpa [#allocation3], 1 }
 0x18a   :  { %566 = vsyncpa [#allocation3 + $0x1], 1 }
 0x18b   :  { %567 = vsyncpa [#allocation6], 1 }
 0x18c   :  { %569 = vsyncpa [#allocation6 + $0x1], 1 }
 0x18d   :  { %570 = vsyncpa [#allocation4], 1 }
 0x18e   :  { %572 = vsyncpa [#allocation4 + $0x1], 1 }

</bundles_post_ra>
